<compile_context>
chip_gen: v5e
topology: v5e:2x2
jax: 0.10.0
libtpu: 0.0.40
codegen_flags: <defaults>
</compile_context>

<pallas_src>
import jax
import jax.numpy as jnp
from jax.experimental import pallas as pl
from jax.experimental.pallas import tpu as pltpu

MAX_LINVEL = 0.5
MAX_ANGVEL = 1.0


def _round_up(x, m):
    return ((x + m - 1) // m) * m


def _dense_lelan_kernel(x_ref, w1_ref, b1_ref, w2_ref, b2_ref, w3_ref, b3_ref,
                        lin_ref, ang_ref):
    # x_ref: (TILE_M, E) f32; w* bf16; b* f32; lin/ang: (TILE_M, H) f32.
    x = x_ref[...].astype(jnp.bfloat16)

    # Layer 1: Linear(E -> E//4) + ReLU  (bf16 MXU, f32 accumulate)
    h1 = jnp.dot(x, w1_ref[...], preferred_element_type=jnp.float32) + b1_ref[...]
    h1 = jnp.maximum(h1, 0.0).astype(jnp.bfloat16)

    # Layer 2: Linear(E//4 -> E//16) + ReLU
    h2 = jnp.dot(h1, w2_ref[...], preferred_element_type=jnp.float32) + b2_ref[...]
    h2 = jnp.maximum(h2, 0.0).astype(jnp.bfloat16)

    # Layer 3: Linear(E//16 -> 2*H) + Sigmoid (f32 tail)
    logits = jnp.dot(h2, w3_ref[...], preferred_element_type=jnp.float32) + b3_ref[...]
    s = jax.nn.sigmoid(logits)

    # Split + scale directly into the two outputs:
    #   lin = max_linvel * s[:, :H]
    #   ang = max_angvel * 2 * (s[:, H:2H] - 0.5)
    horizon = lin_ref.shape[1]
    lin_ref[...] = MAX_LINVEL * s[:, :horizon]
    ang_ref[...] = (2.0 * MAX_ANGVEL) * (s[:, horizon:2 * horizon] - 0.5)


def dense_network_lelan(x, params, embedding_dim, control_horizon, tile_m=1024):
    """JAX/Pallas equivalent of DenseNetwork_lelan.forward.

    x: any shape that flattens to (-1, embedding_dim), float32.
    params: dict with w1 (E, E//4), b1 (1, E//4), w2 (E//4, E//16),
            b2 (1, E//16), w3 (E//16, 2*H), b3 (1, 2*H), all float32.
    Returns (linear_vel, angular_vel), each (batch, control_horizon) float32.
    """
    e = embedding_dim
    h1 = e // 4
    h2 = e // 16
    out_dim = 2 * control_horizon

    x2d = x.reshape((-1, e)).astype(jnp.float32)
    batch = x2d.shape[0]

    # Batch tile: multiple of 8, capped by tile_m, adapted for tiny batches.
    tm = min(tile_m, _round_up(batch, 8))
    padded = _round_up(batch, tm)
    if padded != batch:
        x2d = jnp.pad(x2d, ((0, padded - batch), (0, 0)))
    grid = (padded // tm,)

    w1 = params["w1"].astype(jnp.bfloat16)
    w2 = params["w2"].astype(jnp.bfloat16)
    w3 = params["w3"].astype(jnp.bfloat16)
    b1 = params["b1"].astype(jnp.float32)
    b2 = params["b2"].astype(jnp.float32)
    b3 = params["b3"].astype(jnp.float32)

    const = lambda i: (0, 0)  # weights/biases: VMEM resident, DMA'd once

    lin, ang = pl.pallas_call(
        _dense_lelan_kernel,
        out_shape=(
            jax.ShapeDtypeStruct((padded, control_horizon), jnp.float32),
            jax.ShapeDtypeStruct((padded, control_horizon), jnp.float32),
        ),
        grid=grid,
        in_specs=[
            pl.BlockSpec((tm, e), lambda i: (i, 0)),   # x tile (pipelined)
            pl.BlockSpec((e, h1), const),              # w1
            pl.BlockSpec((1, h1), const),              # b1
            pl.BlockSpec((h1, h2), const),             # w2
            pl.BlockSpec((1, h2), const),              # b2
            pl.BlockSpec((h2, out_dim), const),        # w3
            pl.BlockSpec((1, out_dim), const),         # b3
        ],
        out_specs=[
            pl.BlockSpec((tm, control_horizon), lambda i: (i, 0)),
            pl.BlockSpec((tm, control_horizon), lambda i: (i, 0)),
        ],
        compiler_params=pltpu.CompilerParams(
            dimension_semantics=("parallel",),
        ),
    )(x2d, w1, b1, w2, b2, w3, b3)

    return lin[:batch], ang[:batch]


def init_params(key, embedding_dim, control_horizon):
    e = embedding_dim
    h1 = e // 4
    h2 = e // 16
    out = 2 * control_horizon
    keys = jax.random.split(key, 6)

    def lin_init(kw, kb, fan_in, fan_out):
        bound = 1.0 / jnp.sqrt(jnp.float32(fan_in))
        w = jax.random.uniform(kw, (fan_in, fan_out), jnp.float32, -bound, bound)
        b = jax.random.uniform(kb, (1, fan_out), jnp.float32, -bound, bound)
        return w, b

    w1, b1 = lin_init(keys[0], keys[1], e, h1)
    w2, b2 = lin_init(keys[2], keys[3], h1, h2)
    w3, b3 = lin_init(keys[4], keys[5], h2, out)
    return {"w1": w1, "b1": b1, "w2": w2, "b2": b2, "w3": w3, "b3": b3}


def _reference_bf16(x, params, embedding_dim, control_horizon):
    """Pure-JAX reference mirroring the kernel's bf16-input/f32-accum math."""
    x2d = x.reshape((-1, embedding_dim)).astype(jnp.bfloat16)
    w1 = params["w1"].astype(jnp.bfloat16)
    w2 = params["w2"].astype(jnp.bfloat16)
    w3 = params["w3"].astype(jnp.bfloat16)
    h1 = jnp.maximum(
        jnp.dot(x2d, w1, preferred_element_type=jnp.float32) + params["b1"], 0.0
    ).astype(jnp.bfloat16)
    h2 = jnp.maximum(
        jnp.dot(h1, w2, preferred_element_type=jnp.float32) + params["b2"], 0.0
    ).astype(jnp.bfloat16)
    s = jax.nn.sigmoid(
        jnp.dot(h2, w3, preferred_element_type=jnp.float32) + params["b3"])
    lin = MAX_LINVEL * s[:, :control_horizon]
    ang = MAX_ANGVEL * 2.0 * (s[:, control_horizon:2 * control_horizon] - 0.5)
    return lin, ang


if __name__ == "__main__":
    embedding_dim = 256      # -> hidden dims 64, 16
    control_horizon = 8      # -> final layer outputs 16 values
    batch = 2

    key = jax.random.PRNGKey(0)
    k_x, k_p = jax.random.split(key)
    x = jax.random.normal(k_x, (batch, embedding_dim), jnp.float32)
    params = init_params(k_p, embedding_dim, control_horizon)

    lin_vel, ang_vel = dense_network_lelan(x, params, embedding_dim, control_horizon)
    jax.block_until_ready((lin_vel, ang_vel))

    lin_ref, ang_ref = _reference_bf16(x, params, embedding_dim, control_horizon)
    assert lin_vel.shape == (batch, control_horizon)
    assert ang_vel.shape == (batch, control_horizon)
    assert jnp.allclose(lin_vel, lin_ref, atol=1e-3, rtol=1e-3)
    assert jnp.allclose(ang_vel, ang_ref, atol=1e-3, rtol=1e-3)

    print("KERNEL_OK")
</pallas_src>

<mosaic_0001>
module attributes {stable_mosaic.version = 11 : i64} {
  func.func @_dense_lelan_kernel(%arg0: i32, %arg1: memref<8x256xf32, #tpu.memory_space<vmem>>, %arg2: memref<256x64xbf16, #tpu.memory_space<vmem>>, %arg3: memref<1x64xf32, #tpu.memory_space<vmem>>, %arg4: memref<64x16xbf16, #tpu.memory_space<vmem>>, %arg5: memref<1x16xf32, #tpu.memory_space<vmem>>, %arg6: memref<16x16xbf16, #tpu.memory_space<vmem>>, %arg7: memref<1x16xf32, #tpu.memory_space<vmem>>, %arg8: memref<8x8xf32, #tpu.memory_space<vmem>>, %arg9: memref<8x8xf32, #tpu.memory_space<vmem>>) attributes {dimension_semantics = [#tpu.dimension_semantics<parallel>], iteration_bounds = array<i64: 1>, scalar_prefetch = 0 : i64, scratch_operands = 0 : i64, tpu.core_type = #tpu.core_type<tc>, window_params = [{transform_indices = @transform_0, window_bounds = array<i64: 8, 256>}, {pipeline_mode = #tpu.pipeline_mode<synchronous>, transform_indices = @transform_1, window_bounds = array<i64: 256, 64>}, {pipeline_mode = #tpu.pipeline_mode<synchronous>, transform_indices = @transform_2, window_bounds = array<i64: 1, 64>}, {pipeline_mode = #tpu.pipeline_mode<synchronous>, transform_indices = @transform_3, window_bounds = array<i64: 64, 16>}, {pipeline_mode = #tpu.pipeline_mode<synchronous>, transform_indices = @transform_4, window_bounds = array<i64: 1, 16>}, {pipeline_mode = #tpu.pipeline_mode<synchronous>, transform_indices = @transform_5, window_bounds = array<i64: 16, 16>}, {pipeline_mode = #tpu.pipeline_mode<synchronous>, transform_indices = @transform_6, window_bounds = array<i64: 1, 16>}, {transform_indices = @transform_7, window_bounds = array<i64: 8, 8>}, {transform_indices = @transform_8, window_bounds = array<i64: 8, 8>}]} {
    %c0 = arith.constant 0 : index
    %c0_0 = arith.constant 0 : index
    %0 = vector.load %arg1[%c0, %c0_0] : memref<8x256xf32, #tpu.memory_space<vmem>>, vector<8x256xf32>
    %1 = arith.truncf %0 : vector<8x256xf32> to vector<8x256xbf16>
    %c0_1 = arith.constant 0 : index
    %c0_2 = arith.constant 0 : index
    %2 = vector.load %arg2[%c0_1, %c0_2] : memref<256x64xbf16, #tpu.memory_space<vmem>>, vector<256x64xbf16>
    %cst = arith.constant dense<0.000000e+00> : vector<8x64xf32>
    %3 = tpu.matmul %1, %2, %cst {dimension_numbers = #tpu.dot_dimension_numbers<[1], [0], [0], [1], [0, 0, 1, 1], [], []>} : vector<8x256xbf16>, vector<256x64xbf16>, vector<8x64xf32> -> vector<8x64xf32>
    %c0_3 = arith.constant 0 : index
    %c0_4 = arith.constant 0 : index
    %4 = vector.load %arg3[%c0_3, %c0_4] : memref<1x64xf32, #tpu.memory_space<vmem>>, vector<1x64xf32>
    %5 = vector.broadcast %4 : vector<1x64xf32> to vector<8x64xf32>
    %6 = arith.addf %3, %5 : vector<8x64xf32>
    %cst_5 = arith.constant 0.000000e+00 : f32
    %7 = vector.broadcast %cst_5 : f32 to vector<8x64xf32>
    %8 = arith.maximumf %6, %7 : vector<8x64xf32>
    %9 = arith.truncf %8 : vector<8x64xf32> to vector<8x64xbf16>
    %c0_6 = arith.constant 0 : index
    %c0_7 = arith.constant 0 : index
    %10 = vector.load %arg4[%c0_6, %c0_7] : memref<64x16xbf16, #tpu.memory_space<vmem>>, vector<64x16xbf16>
    %cst_8 = arith.constant dense<0.000000e+00> : vector<8x16xf32>
    %11 = tpu.matmul %9, %10, %cst_8 {dimension_numbers = #tpu.dot_dimension_numbers<[1], [0], [0], [1], [0, 0, 1, 1], [], []>} : vector<8x64xbf16>, vector<64x16xbf16>, vector<8x16xf32> -> vector<8x16xf32>
    %c0_9 = arith.constant 0 : index
    %c0_10 = arith.constant 0 : index
    %12 = vector.load %arg5[%c0_9, %c0_10] : memref<1x16xf32, #tpu.memory_space<vmem>>, vector<1x16xf32>
    %13 = vector.broadcast %12 : vector<1x16xf32> to vector<8x16xf32>
    %14 = arith.addf %11, %13 : vector<8x16xf32>
    %cst_11 = arith.constant 0.000000e+00 : f32
    %15 = vector.broadcast %cst_11 : f32 to vector<8x16xf32>
    %16 = arith.maximumf %14, %15 : vector<8x16xf32>
    %17 = arith.truncf %16 : vector<8x16xf32> to vector<8x16xbf16>
    %c0_12 = arith.constant 0 : index
    %c0_13 = arith.constant 0 : index
    %18 = vector.load %arg6[%c0_12, %c0_13] : memref<16x16xbf16, #tpu.memory_space<vmem>>, vector<16x16xbf16>
    %cst_14 = arith.constant dense<0.000000e+00> : vector<8x16xf32>
    %19 = tpu.matmul %17, %18, %cst_14 {dimension_numbers = #tpu.dot_dimension_numbers<[1], [0], [0], [1], [0, 0, 1, 1], [], []>} : vector<8x16xbf16>, vector<16x16xbf16>, vector<8x16xf32> -> vector<8x16xf32>
    %c0_15 = arith.constant 0 : index
    %c0_16 = arith.constant 0 : index
    %20 = vector.load %arg7[%c0_15, %c0_16] : memref<1x16xf32, #tpu.memory_space<vmem>>, vector<1x16xf32>
    %21 = vector.broadcast %20 : vector<1x16xf32> to vector<8x16xf32>
    %22 = arith.addf %19, %21 : vector<8x16xf32>
    %23 = arith.negf %22 : vector<8x16xf32>
    %24 = math.exp %23 : vector<8x16xf32>
    %cst_17 = arith.constant 1.000000e+00 : f32
    %25 = vector.broadcast %cst_17 : f32 to vector<8x16xf32>
    %26 = arith.addf %25, %24 : vector<8x16xf32>
    %27 = arith.divf %25, %26 : vector<8x16xf32>
    %28 = vector.extract_strided_slice %27 {offsets = [0, 0], sizes = [8, 8], strides = [1, 1]} : vector<8x16xf32> to vector<8x8xf32>
    %cst_18 = arith.constant 5.000000e-01 : f32
    %29 = vector.broadcast %cst_18 : f32 to vector<8x8xf32>
    %30 = arith.mulf %29, %28 : vector<8x8xf32>
    %c0_19 = arith.constant 0 : index
    %c0_20 = arith.constant 0 : index
    %31 = vector.load %arg8[%c0_19, %c0_20] : memref<8x8xf32, #tpu.memory_space<vmem>>, vector<8x8xf32>
    tpu.vector_store %arg8[%c0_19, %c0_20], %30 {strides = array<i32>} : memref<8x8xf32, #tpu.memory_space<vmem>>, vector<8x8xf32>,
    %32 = vector.extract_strided_slice %27 {offsets = [0, 8], sizes = [8, 8], strides = [1, 1]} : vector<8x16xf32> to vector<8x8xf32>
    %cst_21 = arith.constant 5.000000e-01 : f32
    %33 = vector.broadcast %cst_21 : f32 to vector<8x8xf32>
    %34 = arith.subf %32, %33 : vector<8x8xf32>
    %cst_22 = arith.constant 2.000000e+00 : f32
    %35 = vector.broadcast %cst_22 : f32 to vector<8x8xf32>
    %36 = arith.mulf %35, %34 : vector<8x8xf32>
    %c0_23 = arith.constant 0 : index
    %c0_24 = arith.constant 0 : index
    %37 = vector.load %arg9[%c0_23, %c0_24] : memref<8x8xf32, #tpu.memory_space<vmem>>, vector<8x8xf32>
    tpu.vector_store %arg9[%c0_23, %c0_24], %36 {strides = array<i32>} : memref<8x8xf32, #tpu.memory_space<vmem>>, vector<8x8xf32>,
    return
  }
  func.func @transform_0(%arg0: i32) -> (i32, i32) {
    %c0_i32 = arith.constant 0 : i32
    %c0_i32_0 = arith.constant 0 : i32
    return %arg0, %c0_i32 : i32, i32
  }
  func.func @transform_1(%arg0: i32) -> (i32, i32) {
    %c0_i32 = arith.constant 0 : i32
    %c0_i32_0 = arith.constant 0 : i32
    %c0_i32_1 = arith.constant 0 : i32
    return %c0_i32, %c0_i32_0 : i32, i32
  }
  func.func @transform_2(%arg0: i32) -> (i32, i32) {
    %c0_i32 = arith.constant 0 : i32
    %c0_i32_0 = arith.constant 0 : i32
    %c0_i32_1 = arith.constant 0 : i32
    return %c0_i32, %c0_i32_0 : i32, i32
  }
  func.func @transform_3(%arg0: i32) -> (i32, i32) {
    %c0_i32 = arith.constant 0 : i32
    %c0_i32_0 = arith.constant 0 : i32
    %c0_i32_1 = arith.constant 0 : i32
    return %c0_i32, %c0_i32_0 : i32, i32
  }
  func.func @transform_4(%arg0: i32) -> (i32, i32) {
    %c0_i32 = arith.constant 0 : i32
    %c0_i32_0 = arith.constant 0 : i32
    %c0_i32_1 = arith.constant 0 : i32
    return %c0_i32, %c0_i32_0 : i32, i32
  }
  func.func @transform_5(%arg0: i32) -> (i32, i32) {
    %c0_i32 = arith.constant 0 : i32
    %c0_i32_0 = arith.constant 0 : i32
    %c0_i32_1 = arith.constant 0 : i32
    return %c0_i32, %c0_i32_0 : i32, i32
  }
  func.func @transform_6(%arg0: i32) -> (i32, i32) {
    %c0_i32 = arith.constant 0 : i32
    %c0_i32_0 = arith.constant 0 : i32
    %c0_i32_1 = arith.constant 0 : i32
    return %c0_i32, %c0_i32_0 : i32, i32
  }
  func.func @transform_7(%arg0: i32) -> (i32, i32) {
    %c0_i32 = arith.constant 0 : i32
    %c0_i32_0 = arith.constant 0 : i32
    return %arg0, %c0_i32 : i32, i32
  }
  func.func @transform_8(%arg0: i32) -> (i32, i32) {
    %c0_i32 = arith.constant 0 : i32
    %c0_i32_0 = arith.constant 0 : i32
    return %arg0, %c0_i32 : i32, i32
  }
}

</mosaic_0001>

<bundles_post_ra>
// kernel: tpu_custom_call.1
= control target key start
LH: loop header
LB: loop body
LE: loop exit
PB: predicated region body
PF: predicated region fallthrough
CT: control target
= control target key end

     0   :  { %14 = vsyncpa [#allocation3], 0  ;;  %s645_s0 = inlined_call_operand.vmem [shape: f32[8,256], index: 0, kind: input, shape index: {}]   ;;  %s646_s1 = inlined_call_operand.vmem [shape: bf16[256,64], index: 1, kind: input, shape index: {}]   ;;  %s647_s2 = inlined_call_operand.vmem [shape: f32[1,64], index: 2, kind: input, shape index: {}]   ;;  %s648_s3 = inlined_call_operand.vmem [shape: bf16[64,16], index: 3, kind: input, shape index: {}]   ;;  %s649_s4 = inlined_call_operand.vmem [shape: f32[1,16], index: 4, kind: input, shape index: {}]   ;;  %s650_s5 = inlined_call_operand.vmem [shape: bf16[16,16], index: 5, kind: input, shape index: {}]   ;;  %s651_s6 = inlined_call_operand.vmem [shape: f32[1,16], index: 6, kind: input, shape index: {}]   ;;  %s652_s7 = inlined_call_operand.hbm [shape: f32[8,8], index: 7, kind: output, shape index: {0}]   ;;  %s653_s8 = inlined_call_operand.hbm [shape: f32[8,8], index: 8, kind: output, shape index: {1}]  }
   0x1   :  { %v435_v0 = vld [vmem:[%s646_s1 + $0x38] sm:$0xff]  ;;  %v434_v2 = vld [vmem:[%s646_s1 + $0x30] sm:$0xff]  ;;  %v433_v4 = vld [vmem:[%s646_s1 + $0x28] sm:$0xff] }
   0x2   :  { %v443_v1 = vld [vmem:[%s646_s1 + $0x78] sm:$0xff]  ;;  %167 = vmatpush.bf16.msra.mxu0 %v435_v0  ;;  %v442_v3 = vld [vmem:[%s646_s1 + $0x70] sm:$0xff]  ;;  %v441_v5 = vld [vmem:[%s646_s1 + $0x68] sm:$0xff] }
   0x3   :  { %180 = vmatpush.bf16.msra.mxu1 %v443_v1  ;;  %v447_v6 = vld [vmem:[%s648_s3 + $0x18] sm:$0xff]  ;;  %v446_v7 = vld [vmem:[%s648_s3 + $0x10] sm:$0xff] }
   0x4   :  { %239 = vmatpush.bf16.msra.mxu2 %v447_v6 }
   0x6   :  { %168 = vmatpush.bf16.msra.mxu0 %v434_v2 }
   0x7   :  { %181 = vmatpush.bf16.msra.mxu1 %v442_v3 }
   0x8   :  { %15 = vsyncpa [#allocation5], 0  ;;  %v432_v8 = vld [vmem:[%s646_s1 + $0x20] sm:$0xff]  ;;  %240 = vmatpush.bf16.msra.mxu2 %v446_v7  ;;  %v431_v10 = vld [vmem:[%s646_s1 + $0x18] sm:$0xff]  ;;  %vm231_vm0 = vcmask 523264   ;;  %vm262_vm1 = vcmask 130048  }
   0x9   :  { %v440_v9 = vld [vmem:[%s646_s1 + $0x60] sm:$0xff]  ;;  %v439_v11 = vld [vmem:[%s646_s1 + $0x58] sm:$0xff]  ;;  %v430_v12 = vld [vmem:[%s646_s1 + $0x10] sm:$0xff]  ;;  %s315_s10 = sshll.u32 %s652_s7, 4  ;;  %vm299_vm6 = vcmask 64512   ;;  %s512_s11 = smov 120   ;;  %s316_s10 = int_to_ptr.hbm [resolvable:$true] %s315_s10 }
   0xa   :  { %169 = vmatpush.bf16.msra.mxu0 %v433_v4  ;;  %v438_v13 = vld [vmem:[%s646_s1 + $0x50] sm:$0xff]  ;;  %v429_v14 = vld [vmem:[%s646_s1 + $0x8] sm:$0xff]  ;;  %v428_v16 = vld [vmem:[%s646_s1] sm:$0xff]  ;;  %s513_s12 = smov [#allocation4]   ;;  %s326_s7 = sshll.u32 %s653_s8, 4  ;;  %s327_s7 = int_to_ptr.hbm [resolvable:$true] %s326_s7 }
   0xb   :  { %182 = vmatpush.bf16.msra.mxu1 %v441_v5  ;;  %v437_v15 = vld [vmem:[%s646_s1 + $0x48] sm:$0xff]  ;;  %v436_v17 = vld [vmem:[%s646_s1 + $0x40] sm:$0xff]  ;;  %s324_s13 = sshll.u32 %s513_s12, 4  ;;  %s325_s13 = int_to_ptr.vmem [resolvable:$true] %s324_s13 }
   0xc   :  { %v31_v18 = vld [vmem:[%s645_s0] sm:$0xff]  ;;  %v32_v19 = vld [vmem:[%s645_s0 + $0x8] sm:$0xff] }
   0xd   :  { %v33_v20 = vpack.c.bf16 %v31_v18, %v31_v18  ;;  %v34_v21 = vpack.c.bf16 %v32_v19, %v32_v19  ;;  %v445_v22 = vld [vmem:[%s648_s3 + $0x8] sm:$0xff]  ;;  %v444_v23 = vld [vmem:[%s648_s3] sm:$0xff] }
   0xe   :  { %170 = vmatpush.bf16.msra.mxu0 %v432_v8  ;;  %241 = vmatpush.bf16.msra.mxu2 %v445_v22  ;;  %v452_v24 = vld [vmem:[%s647_s2] ss:$0 sm:$0xff] }
   0xf   :  { %183 = vmatpush.bf16.msra.mxu1 %v440_v9  ;;  %v448_v33 = vld [vmem:[%s650_s5] sm:$0xff] }
  0x10   :  { %273 = vmatpush.bf16.msra.mxu3 %v448_v33  ;;  %v453_v34 = vld [vmem:[%s649_s4] ss:$0 sm:$0xff]  ;;  %s511_s4 = smov [#allocation2]  }
  0x11   :  { %v454_v40 = vld [vmem:[%s651_s6] ss:$0 sm:$0xff]  ;;  %s313_s5 = sshll.u32 %s511_s4, 4  ;;  %s314_s5 = int_to_ptr.vmem [resolvable:$true] %s313_s5 }
  0x12   :  { %171 = vmatpush.bf16.msra.mxu0 %v431_v10  ;;  %242 = vmatpush.bf16.msra.mxu2 %v444_v23 }
  0x13   :  { %184 = vmatpush.bf16.msra.mxu1 %v439_v11 }
  0x16   :  { %172 = vmatpush.bf16.msra.mxu0 %v430_v12 }
  0x17   :  { %185 = vmatpush.bf16.msra.mxu1 %v438_v13 }
  0x1a   :  { %173 = vmatpush.bf16.msra.mxu0 %v429_v14 }
  0x1b   :  { %186 = vmatpush.bf16.msra.mxu1 %v437_v15 }
  0x1e   :  { %174 = vmatpush.bf16.msra.mxu0 %v428_v16 }
  0x1f   :  { %187 = vmatpush.bf16.msra.mxu1 %v436_v17 }
  0x21   :  { %175 = vmatmul.bf16.vlgmr.msra.gmra.mxu0 %v33_v20 }
  0x22   :  { %188 = vmatmul.bf16.vlgmr.msra.gmra.mxu1 %v34_v21 }
  0x9e   :  { %v176_v25 = vpop.f32.mrf.mxu0 }
  0x9f   :  { %v189_v26 = vpop.f32.mrf.mxu1  ;;  %v177_v27 = vadd.f32 %v452_v24, %v176_v25 }
  0xa1   :  { %v190_v28 = vadd.f32 %v189_v26, %v177_v27 }
  0xa3   :  { %v193_v29 = vmax.f32 %v190_v28, 0.0 }
  0xa5   :  { %v194_v30 = vpack.c.bf16 %v193_v29, %v193_v29 }
  0xa6   :  { %v178_v31 = vpop.f32.mrf.mxu0 }
  0xa7   :  { %v191_v32 = vpop.f32.mrf.mxu1  ;;  %420 = vmatmul.msk.bf16.vlgmr.msra.gmra.mxu2 %vm231_vm0, %v194_v30 }
 0x12a   :  { %v244_v35 = vpop.f32.mrf.mxu2 }
 0x12b   :  { %v245_v36 = vadd.f32 %v453_v34, %v244_v35 }
 0x12d   :  { %v248_v37 = vmax.f32 %v245_v36, 0.0 }
 0x12f   :  { %v249_v38 = vpack.c.bf16 %v248_v37, %v248_v37 }
 0x131   :  { %425 = vmatmul.msk.bf16.vlgmr.msra.gmra.mxu3 %vm262_vm1, %v249_v38 }
 0x132   :  { %v246_v39 = vpop.f32.mrf.mxu2 }
 0x1b4   :  { %v275_v41 = vpop.f32.mrf.mxu3 }
 0x1b5   :  { %v276_v42 = vadd.f32 %v454_v40, %v275_v41 }
 0x1b7   :  { %v426_v43 = vmul.f32 -1.442695, %v276_v42 }
 0x1b9   :  { %455 = vpow2.f32 %v426_v43 }
 0x1bc   :  { %v277_v44 = vpop.f32.mrf.mxu3 }
 0x1bf   :  { %v456_v45 = vpop.eup %455 }
 0x1c0   :  { %v282_v46 = vadd.f32 1.0, %v456_v45 }
 0x1c2   :  { %457 = vrcp.f32 %v282_v46  ;;  %v294_v50 = vand.u32 2147483648, %v282_v46  ;;  %v292_v52 = vand.u32 2147483647, %v282_v46  ;;  %vm288_vm3 = vweird.f32 %v282_v46 }
 0x1c4   :  { %v295_v54 = vor.u32 1.1754944e-38, %v294_v50  ;;  %vm293_vm5 = vcmp.eq.f32.partialorder %v292_v52, 8.507059e+37 }
 0x1c8   :  { %v458_v47 = vpop.eup %457 }
 0x1c9   :  { %v284_v48 = vmul.f32 %v458_v47, %v282_v46  ;;  %vm289_vm2 = vweird.f32 %v458_v47 }
 0x1ca   :  { %vm290_vm4 = vmor %vm288_vm3, %vm289_vm2 }
 0x1cb   :  { %v285_v49 = vsub.f32 1.0, %v284_v48 }
 0x1cd   :  { %v286_v51 = vmul.f32 %v458_v47, %v285_v49 }
 0x1cf   :  { %v287_v53 = vadd.f32 %v458_v47, %v286_v51 }
 0x1d1   :  { %v291_v55 = vsel %vm290_vm4, %v458_v47, %v287_v53 }
 0x1d2   :  { %v296_v56 = vsel %vm293_vm5, %v295_v54, %v291_v55 }
 0x1d3   :  { %v427_v57 = vadd.f32 -0.5, %v296_v56  ;;  %v298_v58 = vmul.f32 0.5, %v296_v56 }
 0x1d5   :  { %v302_v59 = vmul.f32 2.0, %v427_v57  ;;  %300 = vst.msk [vmem:[#allocation2] sm:$0xff] %vm299_vm6, %v298_v58 }
 0x1d6   :  { %318 = dma.vmem_to_hbm [thread:$0]  %s314_s5, 128, %s316_s10, [#allocation3]  }
 0x1d7   :  { %304 = vrot.lane.b32.xlu0 %v302_v59, %s512_s11 }
 0x249   :  { %v305_v60 = vpop.permute.xlu0 %304 }
 0x24a   :  { %307 = vst.msk [vmem:[#allocation4] sm:$0xff] %vm299_vm6, %v305_v60 }
 0x24b   :  { %329 = dma.vmem_to_hbm [thread:$0]  %s325_s13, 128, %s327_s7, [#allocation5]  }
 0x24c   :  { %507 = dma.done.wait [#allocation3], 128  }
 0x24d   :  { %508 = vsyncadd [#allocation3], 4294967168 }
 0x24e   :  { %509 = dma.done.wait [#allocation5], 128  }
 0x24f   :  { %510 = vsyncadd [#allocation5], 4294967168 }
 0x250   :  { %338 = vsyncpa [#allocation3], 1 }
 0x251   :  { %339 = vsyncpa [#allocation5], 1 }

</bundles_post_ra>
